<compile_context>
chip_gen: v6e
topology: v6e:2x2x1
jax: 0.10.0
libtpu: 0.0.40
codegen_flags: <defaults>
</compile_context>

<pallas_src>
import math
import functools

import jax
import jax.numpy as jnp
from jax import lax
from jax.experimental import pallas as pl
from jax.experimental.pallas import tpu as pltpu

_EPS = 1e-12  # F.normalize default eps (denominator is max(norm, eps))


def _round_up(x, m):
    return (x + m - 1) // m * m


def _sublane(dtype):
    # Minimum sublane multiple for the second-to-last dim, per element width.
    return {4: 8, 2: 16, 1: 32}[jnp.dtype(dtype).itemsize]


def _arcface_kernel_single_k(x_ref, w_ref, ix_ref, iw_ref, o_ref):
    # x_ref:  (tm, Kp) feature tile (matmul dtype)
    # w_ref:  (Kp, tn) pre-transposed weight tile, natural [K, N] MXU layout
    # ix_ref: (tm, 1)  1 / max(||feature_row||, eps)   (f32)
    # iw_ref: (1, tn)  1 / max(||weight_row||, eps)    (f32)
    # o_ref:  (tm, tn) cosine tile
    acc = jnp.dot(x_ref[...], w_ref[...], preferred_element_type=jnp.float32)
    o_ref[...] = (acc * ix_ref[...] * iw_ref[...]).astype(o_ref.dtype)


def _arcface_kernel_multi_k(x_ref, w_ref, ix_ref, iw_ref, o_ref, acc_ref):
    # Only used when in_features does not fit a single K tile.
    @pl.when(pl.program_id(2) == 0)
    def _():
        acc_ref[...] = jnp.zeros_like(acc_ref)

    acc_ref[...] += jnp.dot(x_ref[...], w_ref[...],
                            preferred_element_type=jnp.float32)

    @pl.when(pl.program_id(2) == pl.num_programs(2) - 1)
    def _():
        o_ref[...] = (acc_ref[...] * ix_ref[...] * iw_ref[...]).astype(o_ref.dtype)


@functools.partial(
    jax.jit,
    static_argnames=("matmul_dtype", "out_dtype", "max_tm", "max_tn", "max_tk"),
)
def arc_margin_product(features, weight, *, matmul_dtype=jnp.bfloat16,
                       out_dtype=jnp.float32, max_tm=512, max_tn=512,
                       max_tk=2048):
    """cosine = normalize(features) @ normalize(weight).T via Pallas."""
    B, K = features.shape
    O, K2 = weight.shape
    assert K == K2

    xf = features.astype(jnp.float32)
    wf = weight.astype(jnp.float32)

    # 1 / max(||row||, eps) == rsqrt(max(sum(row^2), eps^2))  (exact identity)
    inv_x = lax.rsqrt(
        jnp.maximum(jnp.sum(xf * xf, axis=-1, keepdims=True), _EPS * _EPS)
    )  # (B, 1)
    inv_w = lax.rsqrt(
        jnp.maximum(jnp.sum(wf * wf, axis=-1, keepdims=True), _EPS * _EPS)
    ).T  # (1, O)

    sub = max(_sublane(matmul_dtype), _sublane(out_dtype))

    # Batch tile: cover the whole (padded) batch when possible so the weight
    # matrix streams from HBM exactly once (i grid axis collapses to 1).
    B_al = _round_up(B, sub)
    tm = B_al if B_al <= max_tm else _round_up(max_tm, sub)
    Bp = _round_up(B, tm)

    # Output tile: lane-dense, multiple of 128 (megacore shards the j axis).
    tn = min(_round_up(max_tn, 128), _round_up(O, 128))
    Op = _round_up(O, tn)

    # K tile: collapse the reduction grid axis whenever K fits in one tile.
    K_al = _round_up(K, 128)
    tk = K_al if K_al <= max_tk else _round_up(max_tk, 128)
    Kp = _round_up(K, tk)
    multi_k = Kp > tk

    # Zero padding only when needed (padded K columns contribute 0 to the dot
    # products; padded rows/cols are sliced off the output).
    xf_p = xf if (Bp, Kp) == (B, K) else jnp.pad(xf, ((0, Bp - B), (0, Kp - K)))
    x = xf_p.astype(matmul_dtype)

    wf_p = wf if (Op, Kp) == (O, K) else jnp.pad(wf, ((0, Op - O), (0, Kp - K)))
    w = wf_p.T.astype(matmul_dtype)  # (Kp, Op): natural [K, N] layout for MXU

    ix = inv_x if Bp == B else jnp.pad(inv_x, ((0, Bp - B), (0, 0)))
    iw = inv_w if Op == O else jnp.pad(inv_w, ((0, 0), (0, Op - O)))

    # Scoped-VMEM estimate (double-buffered inputs/output + f32 accumulator).
    mm_b = jnp.dtype(matmul_dtype).itemsize
    out_b = jnp.dtype(out_dtype).itemsize
    est = (2 * (tm * tk + tk * tn) * mm_b
           + 2 * (tm + tn) * 4
           + 2 * tm * tn * out_b
           + (tm * tn * 4 if multi_k else 0))
    vmem_limit = min(max(int(est * 3 // 2), 32 * 1024 * 1024), 48 * 1024 * 1024)

    if multi_k:
        grid_spec = pltpu.PrefetchScalarGridSpec(
            num_scalar_prefetch=0,
            grid=(Bp // tm, Op // tn, Kp // tk),
            in_specs=[
                pl.BlockSpec((tm, tk), lambda i, j, k: (i, k)),
                pl.BlockSpec((tk, tn), lambda i, j, k: (k, j)),
                pl.BlockSpec((tm, 1), lambda i, j, k: (i, 0)),
                pl.BlockSpec((1, tn), lambda i, j, k: (0, j)),
            ],
            out_specs=pl.BlockSpec((tm, tn), lambda i, j, k: (i, j)),
            scratch_shapes=[pltpu.VMEM((tm, tn), jnp.float32)],
        )
        kernel = _arcface_kernel_multi_k
        dims = ("parallel", "parallel", "arbitrary")
    else:
        grid_spec = pltpu.PrefetchScalarGridSpec(
            num_scalar_prefetch=0,
            grid=(Bp // tm, Op // tn),
            in_specs=[
                pl.BlockSpec((tm, tk), lambda i, j: (i, 0)),
                pl.BlockSpec((tk, tn), lambda i, j: (0, j)),
                pl.BlockSpec((tm, 1), lambda i, j: (i, 0)),
                pl.BlockSpec((1, tn), lambda i, j: (0, j)),
            ],
            out_specs=pl.BlockSpec((tm, tn), lambda i, j: (i, j)),
            scratch_shapes=[],
        )
        kernel = _arcface_kernel_single_k
        dims = ("parallel", "parallel")

    out = pl.pallas_call(
        kernel,
        out_shape=jax.ShapeDtypeStruct((Bp, Op), out_dtype),
        grid_spec=grid_spec,
        compiler_params=pltpu.CompilerParams(
            dimension_semantics=dims,
            vmem_limit_bytes=vmem_limit,
        ),
    )(x, w, ix, iw)

    return out[:B, :O]


if __name__ == "__main__":
    # Small shapes consistent with the module: features [B, in_features],
    # weight [out_features, in_features].
    B, in_features, out_features = 8, 128, 256

    key = jax.random.PRNGKey(0)
    k_feat, k_w = jax.random.split(key)

    features = jax.random.normal(k_feat, (B, in_features), dtype=jnp.float32)

    # Deterministic init matching reset_parameters():
    # weight ~ Uniform(-stdv, stdv), stdv = 1/sqrt(in_features)
    stdv = 1.0 / math.sqrt(in_features)
    weight = jax.random.uniform(
        k_w, (out_features, in_features), dtype=jnp.float32,
        minval=-stdv, maxval=stdv,
    )

    # Default (bf16 MXU operands, f32 accumulation) — the fast path.
    cosine = arc_margin_product(features, weight)
    jax.block_until_ready(cosine)

    # Exact-parity run with f32 operands.
    cosine_f32 = arc_margin_product(features, weight, matmul_dtype=jnp.float32)
    jax.block_until_ready(cosine_f32)

    # Reference in plain JAX (normalize-then-matmul, like PyTorch).
    xn = features / jnp.maximum(
        jnp.linalg.norm(features, axis=-1, keepdims=True), _EPS
    )
    wn = weight / jnp.maximum(
        jnp.linalg.norm(weight, axis=-1, keepdims=True), _EPS
    )
    ref = xn @ wn.T

    assert cosine.shape == (B, out_features)
    assert cosine_f32.shape == (B, out_features)
    assert jnp.max(jnp.abs(cosine_f32 - ref)) < 1e-5      # f32 parity
    assert jnp.max(jnp.abs(cosine - ref)) < 2e-2          # bf16 operands

    print("KERNEL_OK")
</pallas_src>

<mosaic_0001>
module attributes {stable_mosaic.version = 11 : i64} {
  func.func @_arcface_kernel_single_k(%arg0: i32, %arg1: i32, %arg2: memref<16x128xbf16, #tpu.memory_space<vmem>>, %arg3: memref<128x256xbf16, #tpu.memory_space<vmem>>, %arg4: memref<16x1xf32, #tpu.memory_space<vmem>>, %arg5: memref<1x256xf32, #tpu.memory_space<vmem>>, %arg6: memref<16x256xf32, #tpu.memory_space<vmem>>) attributes {dimension_semantics = [#tpu.dimension_semantics<parallel>, #tpu.dimension_semantics<parallel>], iteration_bounds = array<i64: 1, 1>, scalar_prefetch = 0 : i64, scratch_operands = 0 : i64, tpu.core_type = #tpu.core_type<tc>, window_params = [{transform_indices = @transform_0, window_bounds = array<i64: 16, 128>}, {transform_indices = @transform_1, window_bounds = array<i64: 128, 256>}, {transform_indices = @transform_2, window_bounds = array<i64: 16, 1>}, {transform_indices = @transform_3, window_bounds = array<i64: 1, 256>}, {transform_indices = @transform_4, window_bounds = array<i64: 16, 256>}]} {
    %c0 = arith.constant 0 : index
    %c0_0 = arith.constant 0 : index
    %0 = vector.load %arg2[%c0, %c0_0] : memref<16x128xbf16, #tpu.memory_space<vmem>>, vector<16x128xbf16>
    %c0_1 = arith.constant 0 : index
    %c0_2 = arith.constant 0 : index
    %1 = vector.load %arg3[%c0_1, %c0_2] : memref<128x256xbf16, #tpu.memory_space<vmem>>, vector<128x256xbf16>
    %cst = arith.constant dense<0.000000e+00> : vector<16x256xf32>
    %2 = tpu.matmul %0, %1, %cst {dimension_numbers = #tpu.dot_dimension_numbers<[1], [0], [0], [1], [0, 0, 1, 1], [], []>} : vector<16x128xbf16>, vector<128x256xbf16>, vector<16x256xf32> -> vector<16x256xf32>
    %c0_3 = arith.constant 0 : index
    %c0_4 = arith.constant 0 : index
    %3 = vector.load %arg4[%c0_3, %c0_4] : memref<16x1xf32, #tpu.memory_space<vmem>>, vector<16x1xf32>
    %4 = vector.broadcast %3 : vector<16x1xf32> to vector<16x256xf32>
    %5 = arith.mulf %2, %4 : vector<16x256xf32>
    %c0_5 = arith.constant 0 : index
    %c0_6 = arith.constant 0 : index
    %6 = vector.load %arg5[%c0_5, %c0_6] : memref<1x256xf32, #tpu.memory_space<vmem>>, vector<1x256xf32>
    %7 = vector.broadcast %6 : vector<1x256xf32> to vector<16x256xf32>
    %8 = arith.mulf %5, %7 : vector<16x256xf32>
    %c0_7 = arith.constant 0 : index
    %c0_8 = arith.constant 0 : index
    %9 = vector.load %arg6[%c0_7, %c0_8] : memref<16x256xf32, #tpu.memory_space<vmem>>, vector<16x256xf32>
    tpu.vector_store %arg6[%c0_7, %c0_8], %8 {strides = array<i32>} : memref<16x256xf32, #tpu.memory_space<vmem>>, vector<16x256xf32>,
    return
  }
  func.func @transform_0(%arg0: i32, %arg1: i32) -> (i32, i32) {
    %c0_i32 = arith.constant 0 : i32
    %c0_i32_0 = arith.constant 0 : i32
    return %arg0, %c0_i32 : i32, i32
  }
  func.func @transform_1(%arg0: i32, %arg1: i32) -> (i32, i32) {
    %c0_i32 = arith.constant 0 : i32
    %c0_i32_0 = arith.constant 0 : i32
    return %c0_i32, %arg1 : i32, i32
  }
  func.func @transform_2(%arg0: i32, %arg1: i32) -> (i32, i32) {
    %c0_i32 = arith.constant 0 : i32
    %c0_i32_0 = arith.constant 0 : i32
    return %arg0, %c0_i32 : i32, i32
  }
  func.func @transform_3(%arg0: i32, %arg1: i32) -> (i32, i32) {
    %c0_i32 = arith.constant 0 : i32
    %c0_i32_0 = arith.constant 0 : i32
    return %c0_i32, %arg1 : i32, i32
  }
  func.func @transform_4(%arg0: i32, %arg1: i32) -> (i32, i32) {
    %c0_i32 = arith.constant 0 : i32
    return %arg0, %arg1 : i32, i32
  }
}

</mosaic_0001>

<bundles_post_ra>
// kernel: arc_margin_product.1
= control target key start
LH: loop header
LB: loop body
LE: loop exit
PB: predicated region body
PF: predicated region fallthrough
CT: control target
= control target key end

     0   :  { %v249_v1 = vmov 0   ;;  %v183_v20 = vlaneseq  ;;  %s347_s1 = inlined_call_operand.vmem [shape: bf16[128,256], index: 1, kind: input, shape index: {}]   ;;  %s348_s2 = inlined_call_operand.vmem [shape: f32[16,1], index: 2, kind: input, shape index: {}]   ;;  %s349_s0 = inlined_call_operand.vmem [shape: bf16[16,128], index: 0, kind: input, shape index: {}]   ;;  %s350_s3 = inlined_call_operand.vmem [shape: f32[1,256], index: 3, kind: input, shape index: {}]   ;;  %s351_s4 = inlined_call_operand.vmem [shape: f32[16,256], index: 4, kind: output, shape index: {}]  }
   0x1   :  { %v224_v0 = vld [vmem:[%s347_s1 + $0x74] ss:$8 sps:$4 sm:$0xff]   ;;  %154 = vmatprep.mubr.bf16.mxu0 %v249_v1  ;;  %223 = vset.pattern.permute.xlu0 %v249_v1  ;;  %v226_v2 = vld [vmem:[%s347_s1 + $0x70] ss:$8 sps:$4 sm:$0xff]   ;;  %v227_v3 = vld [vmem:[%s347_s1 + $0x64] ss:$8 sps:$4 sm:$0xff]  }
   0x2   :  { %122 = vmatprep.subr.bf16.mxu0 %v224_v0  ;;  %v229_v4 = vld [vmem:[%s347_s1 + $0x60] ss:$8 sps:$4 sm:$0xff]   ;;  %v230_v5 = vld [vmem:[%s347_s1 + $0x54] ss:$8 sps:$4 sm:$0xff]   ;;  %v232_v6 = vld [vmem:[%s347_s1 + $0x50] ss:$8 sps:$4 sm:$0xff]  }
   0x3   :  { %123 = vmatpush1.bf16.msra.mxu0 %v226_v2  ;;  %v233_v7 = vld [vmem:[%s347_s1 + $0x44] ss:$8 sps:$4 sm:$0xff]   ;;  %v235_v8 = vld [vmem:[%s347_s1 + $0x40] ss:$8 sps:$4 sm:$0xff]   ;;  %v236_v10 = vld [vmem:[%s347_s1 + $0x34] ss:$8 sps:$4 sm:$0xff]  }
   0x4   :  { %124 = vmatprep.subr.bf16.mxu0 %v227_v3  ;;  %v165_v9 = vld [vmem:[%s348_s2] sm:$0xff]  ;;  %v166_v11 = vld [vmem:[%s348_s2 + $0x8] sm:$0xff]  ;;  %v238_v12 = vld [vmem:[%s347_s1 + $0x30] ss:$8 sps:$4 sm:$0xff]   ;;  %v184_v21 = vshrl.u32 %v183_v20, 7 }
   0x5   :  { %169 = vperm.xlu0 %223, %v165_v9   ;;  %v239_v13 = vld [vmem:[%s347_s1 + $0x24] ss:$8 sps:$4 sm:$0xff]   ;;  %v241_v14 = vld [vmem:[%s347_s1 + $0x20] ss:$8 sps:$4 sm:$0xff]   ;;  %v242_v15 = vld [vmem:[%s347_s1 + $0x14] ss:$8 sps:$4 sm:$0xff]  }
   0x6   :  { %v244_v16 = vld [vmem:[%s347_s1 + $0x10] ss:$8 sps:$4 sm:$0xff]   ;;  %v245_v17 = vld [vmem:[%s347_s1 + $0x4] ss:$8 sps:$4 sm:$0xff]   ;;  %v247_v18 = vld [vmem:[%s347_s1] ss:$8 sps:$4 sm:$0xff]  }
   0x7   :  { %125 = vmatpush1.bf16.msra.mxu0 %v229_v4  ;;  %v248_v19 = vld [vmem:[%s349_s0] sm:$0xff]   ;;  %v185_v22 = vsub.s32 0, %v184_v21  ;;  %v189_v24 = vsub.s32 1, %v184_v21 }
   0x8   :  { %126 = vmatprep.subr.bf16.mxu0 %v230_v5  ;;  %v181_v23 = vld [vmem:[%s350_s3] sm:$0x3] }
   0x9   :  { %174 = vperm.xlu0 %223, %v166_v11   ;;  %v186_v26 = vrot.slane %v181_v23, %v185_v22  ;;  %v190_v29 = vrot.slane %v181_v23, %v189_v24 }
   0xb   :  { %127 = vmatpush1.bf16.msra.mxu0 %v232_v6 }
   0xc   :  { %128 = vmatprep.subr.bf16.mxu0 %v233_v7 }
   0xf   :  { %129 = vmatpush1.bf16.msra.mxu0 %v235_v8 }
  0x10   :  { %130 = vmatprep.subr.bf16.mxu0 %v236_v10 }
  0x13   :  { %131 = vmatpush1.bf16.msra.mxu0 %v238_v12 }
  0x14   :  { %132 = vmatprep.subr.bf16.mxu0 %v239_v13 }
  0x17   :  { %133 = vmatpush1.bf16.msra.mxu0 %v241_v14 }
  0x18   :  { %134 = vmatprep.subr.bf16.mxu0 %v242_v15 }
  0x1b   :  { %135 = vmatpush1.bf16.msra.mxu0 %v244_v16 }
  0x1c   :  { %136 = vmatprep.subr.bf16.mxu0 %v245_v17 }
  0x1f   :  { %137 = vmatpush1.bf16.msra.mxu0 %v247_v18 }
  0x22   :  { %155 = vmatmul.mubr.bf16.vlgmr.msra.gmra.mxu0 %v248_v19 }
  0x80   :  { %v170_v25 = vpop.permute.xlu0 %169 }
  0x84   :  { %v175_v33 = vpop.permute.xlu0 %174 }
  0xe2   :  { %v156_v27 = vpop.f32.mrf.mxu0 }
  0xe3   :  { %v177_v28 = vmul.f32 %v170_v25, %v156_v27 }
  0xe4   :  { %v158_v30 = vpop.f32.mrf.mxu0 }
  0xe5   :  { %v193_v31 = vmul.f32 %v186_v26, %v177_v28  ;;  %v178_v32 = vmul.f32 %v170_v25, %v158_v30 }
  0xe6   :  { %v160_v34 = vpop.f32.mrf.mxu0 }
  0xe7   :  { %197 = vst [vmem:[%s351_s4] sm:$0xff] %v193_v31  ;;  %v194_v35 = vmul.f32 %v190_v29, %v178_v32  ;;  %v179_v36 = vmul.f32 %v175_v33, %v160_v34 }
  0xe8   :  { %v162_v37 = vpop.f32.mrf.mxu0 }
  0xe9   :  { %198 = vst [vmem:[%s351_s4 + $0x8] sm:$0xff] %v194_v35  ;;  %v195_v38 = vmul.f32 %v186_v26, %v179_v36  ;;  %v180_v39 = vmul.f32 %v175_v33, %v162_v37 }
  0xeb   :  { %199 = vst [vmem:[%s351_s4 + $0x10] sm:$0xff] %v195_v38  ;;  %v196_v40 = vmul.f32 %v190_v29, %v180_v39 }
  0xed   :  { %200 = vst [vmem:[%s351_s4 + $0x18] sm:$0xff] %v196_v40 }

</bundles_post_ra>
